<compile_context>
chip_gen: v6e
topology: v6e:2x2x1
jax: 0.10.0
libtpu: 0.0.40
codegen_flags: <defaults>
</compile_context>

<pallas_src>
import functools
import math

import jax
import jax.numpy as jnp
from jax.experimental import pallas as pl
from jax.experimental.pallas import tpu as pltpu


# ----------------------------------------------------------------------------
# Base NoiseModel (noise_model=None) forward: identity.  No kernel, no copy.
# ----------------------------------------------------------------------------
def noise_model_forward(x: jax.Array, seed: int | None = None) -> jax.Array:
    del seed  # only reseeds the torch RNG; no effect on the identity model
    return x


# ----------------------------------------------------------------------------
# Poisson inverse-CDF sampling shared by both kernel variants.
# ----------------------------------------------------------------------------
def _poisson_counts(lam, u, k_max: int):
    """count = #{ k >= 0 : u >= CDF_lam(k) }   (u uniform in [0, 1))."""
    pmf = jnp.exp(-lam)                                 # P(X = 0)   (EUP slot)
    cdf = pmf
    count = (u >= cdf).astype(jnp.float32)
    for k in range(1, k_max):                           # static unroll, 1/k const
        pmf = pmf * (lam * (1.0 / k))                   # P(X = k)   (VPU only)
        cdf = cdf + pmf
        count = count + (u >= cdf).astype(jnp.float32)
    return count


def _poisson_kernel_ext(scal_ref, x_ref, u_ref, o_ref, *,
                        k_max: int, normalize: bool, clip_positive: bool):
    """Variant with externally supplied uniforms (interpret / CPU fallback)."""
    gain = scal_ref[0]
    inv_gain = scal_ref[1]
    lam = x_ref[...].astype(jnp.float32) * inv_gain
    if clip_positive:
        lam = jnp.maximum(lam, 0.0)
    # NOTE: with clip_positive=False and negative inputs torch.poisson raises;
    # here negative lambdas simply produce 0 counts (behavioral divergence).
    count = _poisson_counts(lam, u_ref[...].astype(jnp.float32), k_max)
    y = count * gain if normalize else count
    o_ref[...] = y.astype(o_ref.dtype)


def _poisson_kernel_prng(scal_ref, seed_ref, x_ref, o_ref, *,
                         k_max: int, normalize: bool, clip_positive: bool):
    """Variant generating the uniforms on-chip with the hardware PRNG."""
    gain = scal_ref[0]
    inv_gain = scal_ref[1]
    # Unique stream per grid block so tiles never repeat the same noise.
    pltpu.prng_seed(seed_ref[0]
                    + pl.program_id(0) * pl.num_programs(1)
                    + pl.program_id(1))
    bits = pltpu.bitcast(pltpu.prng_random_bits(x_ref.shape), jnp.uint32)
    # 23 random mantissa bits -> float in [1, 2) -> uniform in [0, 1).
    u = pltpu.bitcast((bits >> 9) | jnp.uint32(0x3F800000), jnp.float32) - 1.0

    lam = x_ref[...].astype(jnp.float32) * inv_gain
    if clip_positive:
        lam = jnp.maximum(lam, 0.0)
    count = _poisson_counts(lam, u, k_max)
    y = count * gain if normalize else count
    o_ref[...] = y.astype(o_ref.dtype)


# ----------------------------------------------------------------------------
# Layout helpers.
# ----------------------------------------------------------------------------
def _slab_geometry(total: int) -> tuple[int, int]:
    """Pick (rows, cols) with rows % 8 == 0 and cols % 128 == 0 if possible."""
    best_cols = 0
    c = 128
    while c <= min(total, 4096):
        if total % c == 0 and (total // c) % 8 == 0:
            best_cols = c
        c += 128
    if best_cols:
        return total // best_cols, best_cols
    return 0, 0  # caller falls back to the natural trailing-dim view


def _pick_tile(dim: int, align: int, cap: int) -> int:
    """Largest divisor of `dim` that is a multiple of `align` and <= cap.

    Falls back to the full extent (always legal as a single block).
    """
    if dim % align == 0:
        t = min(cap - cap % align, dim)
        while t >= align:
            if dim % t == 0:
                return t
            t -= align
    return dim


# ----------------------------------------------------------------------------
# PoissonNoise forward.
# ----------------------------------------------------------------------------
def poisson_noise(x: jax.Array,
                  gain: float = 1.0,
                  normalize: bool = True,
                  clip_positive: bool = False,
                  seed: int = 0,
                  k_max: int | None = None,
                  lam_max: float | None = None,
                  use_onchip_rng: bool | None = None) -> jax.Array:
    """Equivalent of PoissonNoise(gain, normalize, clip_positive)(x, seed=seed).

    k_max truncates the Poisson support; by default it adapts to the expected
    maximum lambda (lam_max, defaulting to 1/gain for image intensities in
    [0, 1]) as ceil(lam_max + 8*sqrt(lam_max) + 8).
    """
    if use_onchip_rng is None:
        # pltpu.prng_* only lowers through Mosaic; off-TPU (interpret / CPU
        # tests) fall back to pre-drawn uniforms streamed in from HBM.
        use_onchip_rng = jax.default_backend() == "tpu"

    if k_max is None:
        lm = (1.0 / float(gain)) if lam_max is None else float(lam_max)
        lm = max(lm, 1e-3)
        k_max = max(8, int(math.ceil(lm + 8.0 * math.sqrt(lm) + 8.0)))
        k_max = min(k_max, 96)   # beyond this the f32 pmf recursion is unreliable anyway

    orig_shape = x.shape
    total = x.size

    # Sublane/lane-dense slab so small N*C inputs don't waste vreg sublanes.
    rows, cols = _slab_geometry(total)
    if rows == 0:
        # Awkward element count: natural trailing-dim view, single full-extent
        # block per axis is always a legal BlockSpec.
        cols = orig_shape[-1]
        rows = total // cols
    x2d = x.reshape(rows, cols)

    # Tiles: biggest aligned divisors under (512, 2048)  ->  <= 4 MiB blocks.
    tr = _pick_tile(rows, 8, 512)
    tc = _pick_tile(cols, 128, 2048)
    # Give v7x's two TensorCores at least two parallel blocks when possible.
    if rows // tr == 1 and cols // tc == 1:
        if tc % 256 == 0:
            tc //= 2
        elif tr % 16 == 0:
            tr //= 2
    grid = (rows // tr, cols // tc)

    gain_f32 = jnp.float32(gain)
    scal = jnp.stack([gain_f32, jnp.float32(1.0) / gain_f32]).astype(jnp.float32)

    n_streams = 2 if use_onchip_rng else 3               # x (+u) + out, f32
    cost = pl.CostEstimate(flops=6 * k_max * total,
                           transcendentals=total,
                           bytes_accessed=4 * n_streams * total)
    cparams = pltpu.CompilerParams(
        dimension_semantics=("parallel", "parallel"),
        # 3 streams x 2 buffers x 4 MiB = 24 MiB worst case; 48 MiB budget fits
        # v7x's 64 MiB physical VMEM and lifts v5e's 16 MiB scoped default.
        vmem_limit_bytes=48 << 20)

    out_shape = jax.ShapeDtypeStruct((rows, cols), x.dtype)
    blk = pl.BlockSpec((tr, tc), lambda i, j: (i, j))

    if use_onchip_rng:
        kernel = functools.partial(_poisson_kernel_prng, k_max=k_max,
                                   normalize=normalize,
                                   clip_positive=clip_positive)
        seed_arr = jnp.asarray([seed], dtype=jnp.int32)
        out2d = pl.pallas_call(
            kernel,
            out_shape=out_shape,
            grid=grid,
            in_specs=[
                pl.BlockSpec(memory_space=pltpu.SMEM),     # [gain, 1/gain]
                pl.BlockSpec(memory_space=pltpu.SMEM),     # seed
                blk,                                       # x
            ],
            out_specs=blk,
            compiler_params=cparams,
            cost_estimate=cost,
        )(scal, seed_arr, x2d)
    else:
        kernel = functools.partial(_poisson_kernel_ext, k_max=k_max,
                                   normalize=normalize,
                                   clip_positive=clip_positive)
        # Decorrelate the noise stream from any key the caller used to build x
        # (the previous version reused PRNGKey(seed) directly, which made the
        # uniforms identical to x in the demo and biased the counts).
        noise_key = jax.random.fold_in(jax.random.PRNGKey(seed), 1013904223)
        u2d = jax.random.uniform(noise_key, (rows, cols), dtype=jnp.float32)
        out2d = pl.pallas_call(
            kernel,
            out_shape=out_shape,
            grid=grid,
            in_specs=[
                pl.BlockSpec(memory_space=pltpu.SMEM),     # [gain, 1/gain]
                blk,                                       # x
                blk,                                       # uniforms
            ],
            out_specs=blk,
            compiler_params=cparams,
            cost_estimate=cost,
        )(scal, x2d, u2d)

    return out2d.reshape(orig_shape)


if __name__ == "__main__":
    key = jax.random.PRNGKey(0)
    # NCHW image-like input in [0, 1), as in the PoissonNoise docstring example.
    x = jax.random.uniform(key, (2, 4, 16, 16), dtype=jnp.float32)

    # Default PoissonNoise: gain=1, normalize=True, clip_positive=False.
    y = jax.block_until_ready(poisson_noise(x, gain=1.0, normalize=True,
                                            clip_positive=False, seed=0))
    assert y.shape == x.shape and y.dtype == x.dtype
    assert bool(jnp.all(y >= 0.0))
    assert bool(jnp.all(y == jnp.round(y)))          # integer counts (gain = 1)
    # Poisson(lam) has mean lam; over 2048 samples the std of the mean ~ 0.016,
    # so the sample mean of y tracks mean(x) well within 0.12.
    assert abs(float(jnp.mean(y)) - float(jnp.mean(x))) < 0.12

    # clip_positive path with a different gain: output must be a non-negative
    # multiple of the gain.
    x_shift = x - 0.25
    y2 = jax.block_until_ready(poisson_noise(x_shift, gain=0.5, normalize=True,
                                             clip_positive=True, seed=1))
    assert y2.shape == x.shape and y2.dtype == x.dtype
    assert bool(jnp.all(y2 >= 0.0))
    counts2 = y2 / 0.5
    assert bool(jnp.all(counts2 == jnp.round(counts2)))

    # normalize=False returns raw integer counts.
    y3 = jax.block_until_ready(poisson_noise(x, gain=0.5, normalize=False,
                                             clip_positive=False, seed=2))
    assert bool(jnp.all(y3 == jnp.round(y3)))

    # Base NoiseModel (identity) forward — no kernel, no copy.
    z = noise_model_forward(x, seed=123)
    assert z.shape == x.shape and bool(jnp.all(z == x))

    print("KERNEL_OK")
</pallas_src>

<mosaic_0001>
module attributes {stable_mosaic.version = 11 : i64} {
  func.func @_poisson_kernel_ext(%arg0: i32, %arg1: i32, %arg2: memref<2xf32, #tpu.memory_space<smem>>, %arg3: memref<8x128xf32, #tpu.memory_space<vmem>>, %arg4: memref<8x128xf32, #tpu.memory_space<vmem>>, %arg5: memref<8x128xf32, #tpu.memory_space<vmem>>) attributes {dimension_semantics = [#tpu.dimension_semantics<parallel>, #tpu.dimension_semantics<parallel>], iteration_bounds = array<i64: 1, 2>, scalar_prefetch = 0 : i64, scratch_operands = 0 : i64, tpu.core_type = #tpu.core_type<tc>, window_params = [{transform_indices = @transform_0, window_bounds = array<i64: 2>}, {transform_indices = @transform_1, window_bounds = array<i64: 8, 128>}, {transform_indices = @transform_2, window_bounds = array<i64: 8, 128>}, {transform_indices = @transform_3, window_bounds = array<i64: 8, 128>}]} {
    %c0 = arith.constant 0 : index
    %0 = memref.load %arg2[%c0] : memref<2xf32, #tpu.memory_space<smem>>
    %c1 = arith.constant 1 : index
    %1 = memref.load %arg2[%c1] : memref<2xf32, #tpu.memory_space<smem>>
    %c0_0 = arith.constant 0 : index
    %c0_1 = arith.constant 0 : index
    %2 = vector.load %arg3[%c0_0, %c0_1] : memref<8x128xf32, #tpu.memory_space<vmem>>, vector<8x128xf32>
    %3 = vector.broadcast %1 : f32 to vector<8x128xf32>
    %4 = arith.mulf %2, %3 : vector<8x128xf32>
    %c0_2 = arith.constant 0 : index
    %c0_3 = arith.constant 0 : index
    %5 = vector.load %arg4[%c0_2, %c0_3] : memref<8x128xf32, #tpu.memory_space<vmem>>, vector<8x128xf32>
    %cst = arith.constant 0.000000e+00 : f32
    %6 = vector.broadcast %cst : f32 to vector<8x128xf32>
    %7 = arith.subf %6, %4 : vector<8x128xf32>
    %8 = math.exp %7 : vector<8x128xf32>
    %9 = arith.cmpf oge, %5, %8 : vector<8x128xf32>
    %10 = arith.extui %9 : vector<8x128xi1> to vector<8x128xi32>
    %11 = arith.sitofp %10 : vector<8x128xi32> to vector<8x128xf32>
    %cst_4 = arith.constant 1.000000e+00 : f32
    %12 = vector.broadcast %cst_4 : f32 to vector<8x128xf32>
    %13 = arith.mulf %4, %12 : vector<8x128xf32>
    %14 = arith.mulf %8, %13 : vector<8x128xf32>
    %15 = arith.addf %8, %14 : vector<8x128xf32>
    %16 = arith.cmpf oge, %5, %15 : vector<8x128xf32>
    %17 = arith.extui %16 : vector<8x128xi1> to vector<8x128xi32>
    %18 = arith.sitofp %17 : vector<8x128xi32> to vector<8x128xf32>
    %19 = arith.addf %11, %18 : vector<8x128xf32>
    %cst_5 = arith.constant 5.000000e-01 : f32
    %20 = vector.broadcast %cst_5 : f32 to vector<8x128xf32>
    %21 = arith.mulf %4, %20 : vector<8x128xf32>
    %22 = arith.mulf %14, %21 : vector<8x128xf32>
    %23 = arith.addf %15, %22 : vector<8x128xf32>
    %24 = arith.cmpf oge, %5, %23 : vector<8x128xf32>
    %25 = arith.extui %24 : vector<8x128xi1> to vector<8x128xi32>
    %26 = arith.sitofp %25 : vector<8x128xi32> to vector<8x128xf32>
    %27 = arith.addf %19, %26 : vector<8x128xf32>
    %cst_6 = arith.constant 0.333333343 : f32
    %28 = vector.broadcast %cst_6 : f32 to vector<8x128xf32>
    %29 = arith.mulf %4, %28 : vector<8x128xf32>
    %30 = arith.mulf %22, %29 : vector<8x128xf32>
    %31 = arith.addf %23, %30 : vector<8x128xf32>
    %32 = arith.cmpf oge, %5, %31 : vector<8x128xf32>
    %33 = arith.extui %32 : vector<8x128xi1> to vector<8x128xi32>
    %34 = arith.sitofp %33 : vector<8x128xi32> to vector<8x128xf32>
    %35 = arith.addf %27, %34 : vector<8x128xf32>
    %cst_7 = arith.constant 2.500000e-01 : f32
    %36 = vector.broadcast %cst_7 : f32 to vector<8x128xf32>
    %37 = arith.mulf %4, %36 : vector<8x128xf32>
    %38 = arith.mulf %30, %37 : vector<8x128xf32>
    %39 = arith.addf %31, %38 : vector<8x128xf32>
    %40 = arith.cmpf oge, %5, %39 : vector<8x128xf32>
    %41 = arith.extui %40 : vector<8x128xi1> to vector<8x128xi32>
    %42 = arith.sitofp %41 : vector<8x128xi32> to vector<8x128xf32>
    %43 = arith.addf %35, %42 : vector<8x128xf32>
    %cst_8 = arith.constant 2.000000e-01 : f32
    %44 = vector.broadcast %cst_8 : f32 to vector<8x128xf32>
    %45 = arith.mulf %4, %44 : vector<8x128xf32>
    %46 = arith.mulf %38, %45 : vector<8x128xf32>
    %47 = arith.addf %39, %46 : vector<8x128xf32>
    %48 = arith.cmpf oge, %5, %47 : vector<8x128xf32>
    %49 = arith.extui %48 : vector<8x128xi1> to vector<8x128xi32>
    %50 = arith.sitofp %49 : vector<8x128xi32> to vector<8x128xf32>
    %51 = arith.addf %43, %50 : vector<8x128xf32>
    %cst_9 = arith.constant 0.166666672 : f32
    %52 = vector.broadcast %cst_9 : f32 to vector<8x128xf32>
    %53 = arith.mulf %4, %52 : vector<8x128xf32>
    %54 = arith.mulf %46, %53 : vector<8x128xf32>
    %55 = arith.addf %47, %54 : vector<8x128xf32>
    %56 = arith.cmpf oge, %5, %55 : vector<8x128xf32>
    %57 = arith.extui %56 : vector<8x128xi1> to vector<8x128xi32>
    %58 = arith.sitofp %57 : vector<8x128xi32> to vector<8x128xf32>
    %59 = arith.addf %51, %58 : vector<8x128xf32>
    %cst_10 = arith.constant 0.142857149 : f32
    %60 = vector.broadcast %cst_10 : f32 to vector<8x128xf32>
    %61 = arith.mulf %4, %60 : vector<8x128xf32>
    %62 = arith.mulf %54, %61 : vector<8x128xf32>
    %63 = arith.addf %55, %62 : vector<8x128xf32>
    %64 = arith.cmpf oge, %5, %63 : vector<8x128xf32>
    %65 = arith.extui %64 : vector<8x128xi1> to vector<8x128xi32>
    %66 = arith.sitofp %65 : vector<8x128xi32> to vector<8x128xf32>
    %67 = arith.addf %59, %66 : vector<8x128xf32>
    %cst_11 = arith.constant 1.250000e-01 : f32
    %68 = vector.broadcast %cst_11 : f32 to vector<8x128xf32>
    %69 = arith.mulf %4, %68 : vector<8x128xf32>
    %70 = arith.mulf %62, %69 : vector<8x128xf32>
    %71 = arith.addf %63, %70 : vector<8x128xf32>
    %72 = arith.cmpf oge, %5, %71 : vector<8x128xf32>
    %73 = arith.extui %72 : vector<8x128xi1> to vector<8x128xi32>
    %74 = arith.sitofp %73 : vector<8x128xi32> to vector<8x128xf32>
    %75 = arith.addf %67, %74 : vector<8x128xf32>
    %cst_12 = arith.constant 0.111111112 : f32
    %76 = vector.broadcast %cst_12 : f32 to vector<8x128xf32>
    %77 = arith.mulf %4, %76 : vector<8x128xf32>
    %78 = arith.mulf %70, %77 : vector<8x128xf32>
    %79 = arith.addf %71, %78 : vector<8x128xf32>
    %80 = arith.cmpf oge, %5, %79 : vector<8x128xf32>
    %81 = arith.extui %80 : vector<8x128xi1> to vector<8x128xi32>
    %82 = arith.sitofp %81 : vector<8x128xi32> to vector<8x128xf32>
    %83 = arith.addf %75, %82 : vector<8x128xf32>
    %cst_13 = arith.constant 1.000000e-01 : f32
    %84 = vector.broadcast %cst_13 : f32 to vector<8x128xf32>
    %85 = arith.mulf %4, %84 : vector<8x128xf32>
    %86 = arith.mulf %78, %85 : vector<8x128xf32>
    %87 = arith.addf %79, %86 : vector<8x128xf32>
    %88 = arith.cmpf oge, %5, %87 : vector<8x128xf32>
    %89 = arith.extui %88 : vector<8x128xi1> to vector<8x128xi32>
    %90 = arith.sitofp %89 : vector<8x128xi32> to vector<8x128xf32>
    %91 = arith.addf %83, %90 : vector<8x128xf32>
    %cst_14 = arith.constant 0.0909090936 : f32
    %92 = vector.broadcast %cst_14 : f32 to vector<8x128xf32>
    %93 = arith.mulf %4, %92 : vector<8x128xf32>
    %94 = arith.mulf %86, %93 : vector<8x128xf32>
    %95 = arith.addf %87, %94 : vector<8x128xf32>
    %96 = arith.cmpf oge, %5, %95 : vector<8x128xf32>
    %97 = arith.extui %96 : vector<8x128xi1> to vector<8x128xi32>
    %98 = arith.sitofp %97 : vector<8x128xi32> to vector<8x128xf32>
    %99 = arith.addf %91, %98 : vector<8x128xf32>
    %cst_15 = arith.constant 0.0833333358 : f32
    %100 = vector.broadcast %cst_15 : f32 to vector<8x128xf32>
    %101 = arith.mulf %4, %100 : vector<8x128xf32>
    %102 = arith.mulf %94, %101 : vector<8x128xf32>
    %103 = arith.addf %95, %102 : vector<8x128xf32>
    %104 = arith.cmpf oge, %5, %103 : vector<8x128xf32>
    %105 = arith.extui %104 : vector<8x128xi1> to vector<8x128xi32>
    %106 = arith.sitofp %105 : vector<8x128xi32> to vector<8x128xf32>
    %107 = arith.addf %99, %106 : vector<8x128xf32>
    %cst_16 = arith.constant 0.0769230798 : f32
    %108 = vector.broadcast %cst_16 : f32 to vector<8x128xf32>
    %109 = arith.mulf %4, %108 : vector<8x128xf32>
    %110 = arith.mulf %102, %109 : vector<8x128xf32>
    %111 = arith.addf %103, %110 : vector<8x128xf32>
    %112 = arith.cmpf oge, %5, %111 : vector<8x128xf32>
    %113 = arith.extui %112 : vector<8x128xi1> to vector<8x128xi32>
    %114 = arith.sitofp %113 : vector<8x128xi32> to vector<8x128xf32>
    %115 = arith.addf %107, %114 : vector<8x128xf32>
    %cst_17 = arith.constant 0.0714285746 : f32
    %116 = vector.broadcast %cst_17 : f32 to vector<8x128xf32>
    %117 = arith.mulf %4, %116 : vector<8x128xf32>
    %118 = arith.mulf %110, %117 : vector<8x128xf32>
    %119 = arith.addf %111, %118 : vector<8x128xf32>
    %120 = arith.cmpf oge, %5, %119 : vector<8x128xf32>
    %121 = arith.extui %120 : vector<8x128xi1> to vector<8x128xi32>
    %122 = arith.sitofp %121 : vector<8x128xi32> to vector<8x128xf32>
    %123 = arith.addf %115, %122 : vector<8x128xf32>
    %cst_18 = arith.constant 0.0666666701 : f32
    %124 = vector.broadcast %cst_18 : f32 to vector<8x128xf32>
    %125 = arith.mulf %4, %124 : vector<8x128xf32>
    %126 = arith.mulf %118, %125 : vector<8x128xf32>
    %127 = arith.addf %119, %126 : vector<8x128xf32>
    %128 = arith.cmpf oge, %5, %127 : vector<8x128xf32>
    %129 = arith.extui %128 : vector<8x128xi1> to vector<8x128xi32>
    %130 = arith.sitofp %129 : vector<8x128xi32> to vector<8x128xf32>
    %131 = arith.addf %123, %130 : vector<8x128xf32>
    %cst_19 = arith.constant 6.250000e-02 : f32
    %132 = vector.broadcast %cst_19 : f32 to vector<8x128xf32>
    %133 = arith.mulf %4, %132 : vector<8x128xf32>
    %134 = arith.mulf %126, %133 : vector<8x128xf32>
    %135 = arith.addf %127, %134 : vector<8x128xf32>
    %136 = arith.cmpf oge, %5, %135 : vector<8x128xf32>
    %137 = arith.extui %136 : vector<8x128xi1> to vector<8x128xi32>
    %138 = arith.sitofp %137 : vector<8x128xi32> to vector<8x128xf32>
    %139 = arith.addf %131, %138 : vector<8x128xf32>
    %140 = vector.broadcast %0 : f32 to vector<8x128xf32>
    %141 = arith.mulf %139, %140 : vector<8x128xf32>
    %c0_20 = arith.constant 0 : index
    %c0_21 = arith.constant 0 : index
    %142 = vector.load %arg5[%c0_20, %c0_21] : memref<8x128xf32, #tpu.memory_space<vmem>>, vector<8x128xf32>
    tpu.vector_store %arg5[%c0_20, %c0_21], %141 {strides = array<i32>} : memref<8x128xf32, #tpu.memory_space<vmem>>, vector<8x128xf32>,
    return
  }
  func.func @transform_0(%arg0: i32, %arg1: i32) -> i32 {
    %c0_i32 = arith.constant 0 : i32
    %c0_i32_0 = arith.constant 0 : i32
    return %c0_i32 : i32
  }
  func.func @transform_1(%arg0: i32, %arg1: i32) -> (i32, i32) {
    %c0_i32 = arith.constant 0 : i32
    return %arg0, %arg1 : i32, i32
  }
  func.func @transform_2(%arg0: i32, %arg1: i32) -> (i32, i32) {
    %c0_i32 = arith.constant 0 : i32
    return %arg0, %arg1 : i32, i32
  }
  func.func @transform_3(%arg0: i32, %arg1: i32) -> (i32, i32) {
    %c0_i32 = arith.constant 0 : i32
    return %arg0, %arg1 : i32, i32
  }
}

</mosaic_0001>

<bundles_post_ra>
// kernel: tpu_custom_call.1
= control target key start
LH: loop header
LB: loop body
LE: loop exit
PB: predicated region body
PF: predicated region fallthrough
CT: control target
= control target key end

     0   :  { %s1068_s0 = inlined_call_operand.hbm [shape: f32[2], index: 0, kind: input, shape index: {}]   ;;  %s1069_s1 = inlined_call_operand.hbm [shape: f32[8,256], index: 1, kind: input, shape index: {}]   ;;  %s1070_s2 = inlined_call_operand.hbm [shape: f32[8,256], index: 2, kind: input, shape index: {}]   ;;  %s1071_s3 = inlined_call_operand.hbm [shape: f32[8,256], index: 3, kind: output, shape index: {}]  }
   0x1   :  { %1072 = sst [smem:[#allocation14_spill]] %s1068_s0 }
   0x2   :  { %8 = vsyncpa [#allocation5], 0 }
   0x3   :  { %9 = vsyncpa [#allocation3], 0 }
   0x4   :  { %11 = vsyncpa [#allocation3 + $0x1], 0 }
   0x5   :  { %12 = vsyncpa [#allocation8], 0 }
   0x6   :  { %14 = vsyncpa [#allocation8 + $0x1], 0 }
   0x7   :  { %15 = vsyncpa [#allocation4], 0 }
   0x8   :  { %17 = vsyncpa [#allocation4 + $0x1], 0  ;;  %s817_s12 = smov 0   ;;  %s819_s13 = smov 0  }
   0x9   :  { %s821_s14 = smov 0   ;;  %s823_s15 = smov 0  }
   0xa   :  { %s825_s16 = smov 0   ;;  %s827_s17 = smov 0  }
   0xb LB: > { %s518_s18 = sadd.s32 4294967295, %s790_s17   ;;  %s519_s19 = sadd.s32 4294967294, %s790_s17   ;;  %s790_s17 = sphi %s827_s17, %s23_s17   ;;  %s786_s16 = sphi %s825_s16, %s1087_s16   ;;  %s782_s15 = sphi %s823_s15, %s1086_s15   ;;  %s778_s14 = sphi %s821_s14, %s1085_s14   ;;  %s774_s13 = sphi %s819_s13, %s1084_s13   ;;  %s770_s12 = sphi %s817_s12, %s1083_s12  }
   0xc   : > { %p72_p0 = scmp.ne.s32.totalorder %s778_s14, %s774_s13  ;;  %p78_p1 = scmp.ne.s32.totalorder %s774_s13, %s770_s12 }
   0xd   : > { %p853_p2 = scmp.eq.s32.totalorder %s518_s18, 0  ;;  %p132_p3 = scmp.eq.s32.totalorder %s518_s18, 1 }
   0xe   : > { %p138_p4 = scmp.eq.s32.totalorder %s519_s19, 1  ;;  %p520_p5 = scmp.ge.s32.totalorder %s790_s17, 1 }
   0xf   : > { %p860_p6 = por %p853_p2, %p78_p1  ;;  %p867_p7 = por %p132_p3, %p72_p0 }
  0x10   : > { %p871_p8 = por %p138_p4, %p78_p1  ;;  %p145_p9 = scmp.lt.s32.totalorder %s790_s17, 3 }
  0x11   : > { %s65_s25 = sadd.s32 1, %s778_s14  ;;  %s32_s26 = sadd.s32 1, %s786_s16 }
  0x12   : > { %s1076_s23 = scalar_select %p871_p8, 1, 0 }
  0x13   : > { %p876_p10 = pnand %p520_p5, %p145_p9  ;;  %p73_p13 = scmp.eq.s32.totalorder %s790_s17, 0 }
  0x14   : > { %p33_p3 = scmp.ge.s32.totalorder %s32_s26, 2  ;;  %p580_p5 = scmp.lt.s32.totalorder %s790_s17, 2 }
  0x15   : > { %p564_p12 = pneg %p876_p10  ;;  %p891_p4 = por %p73_p13, %p72_p0 }
  0x16   : > { %s897_s28 = sand.u32 1, %s778_s14   ;;  %s792_s29 = smov [#allocation2]  }
  0x17   : > { %p565_p1 = pnand %p564_p12, %p853_p2  ;;  %s1079_s0 = sld [smem:[#allocation14_spill]] }
  0x18   : > { %s1089_s26 = smov (%p33_p3, %s32_s26), 0  ;;  %s523_s5 = sshll.u32 %s897_s28, 3 }
  0x19   : > { %s61_s6 = ssub.s32 %s786_s16, %s1089_s26  ;;  %s524_s7 = sshll.u32 %s786_s16, 7 }
  0x1a   : > { %p63_p0 = scmp.eq.s32.totalorder %s61_s6, 0  ;;  %s178_s10 = scalar_lea.hbm %s1069_s1, %s524_s7 }
  0x1b   : > { %s171_s11 = scalar_lea.vmem [#allocation6], %s523_s5  ;;  %p918_p9 = pnand %p580_p5, %p891_p4 }
  0x1c   : > { %s180_s18 = sshll.u32 %s171_s11, 4  ;;  %s925_s6 = scalar_lea.hbm %s1070_s2, %s524_s7  ;;  %s181_s18 = int_to_ptr.vmem [resolvable:$true] %s180_s18 }
  0x1d   : > { %567 = dma.hbm_to_smem (!%p565_p1), %s1079_s0, 16, %s792_s29, [#allocation5]  }
  0x1e   : > { %s912_s19 = scalar_select %p63_p0, %s778_s14, %s65_s25  }
  0x1f   : > { %s168_s8 = scalar_lea.sflag [#allocation3], %s897_s28  ;;  %p648_p12 = pneg %p918_p9 }
  0x20   : > { %s659_s9 = scalar_lea.vmem %s181_s18, 128  ;;  %s793_s25 = smov [#allocation6]  }
  0x21   : > { %p660_p13 = scmp.ne.s32.totalorder %s181_s18, %s659_s9  ;;  %s664_s27 = sshll.u32 %s793_s25, 4  ;;  %s665_s27 = int_to_ptr.vmem [resolvable:$false] %s664_s27 }
  0x22   : > { %s666_s11 = scalar_lea.vmem %s665_s27, 256  ;;  %p667_p4 = scmp.lt.s32.totalorder %s181_s18, %s665_s27 }
  0x23   : > { %p662_p1 = pnand %p660_p13, %p648_p12  ;;  %p668_p5 = scmp.lt.s32.totalorder %s666_s11, %s659_s9 }
  0x25   : > { %p663_p3 = pneg %p662_p1  ;;  %p669_p0 = por %p668_p5, %p667_p4 }
  0x27   : > { %p670_p11 = pnand %p669_p0, %p663_p3 }
  0x29   : > { %673 = shalt.err (!%p670_p11)
}
  0x2a   : > { %571 = dma.hbm_to_vmem [thread:$0]  (!%p918_p9), %s178_s10, 128, %s181_s18, %s168_s8  }
  0x2b   : > { %s191_s7 = scalar_lea.vmem [#allocation7], %s523_s5  ;;  %s188_s4 = scalar_lea.sflag [#allocation8], %s897_s28 }
  0x2c   : > { %s200_s30 = sshll.u32 %s191_s7, 4  ;;  %s794_s25 = smov [#allocation7]   ;;  %s201_s30 = int_to_ptr.vmem [resolvable:$true] %s200_s30 }
  0x2d   : > { %s687_s0 = scalar_lea.vmem %s201_s30, 128  ;;  %s692_s9 = sshll.u32 %s794_s25, 4  ;;  %s693_s9 = int_to_ptr.vmem [resolvable:$false] %s692_s9 }
  0x2e   : > { %p688_p13 = scmp.ne.s32.totalorder %s201_s30, %s687_s0  ;;  %s694_s27 = scalar_lea.vmem %s693_s9, 256 }
  0x2f   : > { %p695_p11 = scmp.lt.s32.totalorder %s201_s30, %s693_s9  ;;  %p696_p3 = scmp.lt.s32.totalorder %s694_s27, %s687_s0 }
  0x30   : > { %p690_p1 = pnand %p688_p13, %p648_p12 }
  0x31   : > { %p697_p4 = por %p696_p3, %p695_p11 }
  0x32   : > { %p691_p8 = pneg %p690_p1 }
  0x34   : > { %p698_p5 = pnand %p697_p4, %p691_p8 }
  0x36   : > { %701 = shalt.err (!%p698_p5)
}
  0x37   : > { %574 = dma.hbm_to_vmem [thread:$0]  (!%p918_p9), %s925_s6, 128, %s201_s30, %s188_s4  }
  0x38   : > { %209 = sbr.rel (%p876_p10) target bundleno = 150 (0x96), region = 32 }
  0x3d   : > { %753 = dma.done.wait (%p853_p2), [#allocation5], 16  }
  0x3e   : > { %755 = vsyncadd (%p853_p2), [#allocation5], 4294967280  ;;  %s949_s28 = sand.u32 1, %s774_s13  }
  0x3f   : > { %s952_s0 = sshll.u32 %s949_s28, 3  ;;  %s216_s5 = scalar_lea.sflag [#allocation3], %s949_s28 }
  0x40   : > { %s219_s10 = scalar_lea.vmem [#allocation6], %s952_s0 }
  0x41   : > { %757 = dma.done.wait (%p860_p6), %s216_s5, 128  }
  0x42   : > { %759 = vsyncadd (%p860_p6), %s216_s5, 4294967168  ;;  %s225_s20 = scalar_lea.sflag [#allocation8], %s949_s28  ;;  %s228_s24 = scalar_lea.vmem [#allocation7], %s952_s0 }
  0x43   : > { %761 = dma.done.wait (%p860_p6), %s225_s20, 128  }
  0x44   : > { %763 = vsyncadd (%p860_p6), %s225_s20, 4294967168 }
  0x45   : > { %233 = sfence }
  0x46   : > { %s532_s18 = sld [smem:[#allocation2 + $0x1]]  ;;  %v259_v0 = vld [vmem:[%s219_s10] sm:$0xff]  ;;  %v969_v5 = vld [vmem:[%s228_s24] sm:$0xff]  ;;  %v795_v13 = vmov 0.0   ;;  %s256_s29 = scalar_lea.vmem [#allocation9], %s952_s0 }
  0x47   : > { %s257_s21 = sld [smem:[#allocation2]]  ;;  %s399_s6 = sshll.u32 %s256_s29, 4  ;;  %s1023_s6 = int_to_ptr.vmem [resolvable:$true] %s399_s6 }
  0x48   : > { %s551_s8 = sshll.u32 %s782_s15, 7  ;;  %s384_s4 = scalar_lea.sflag [#allocation4], %s949_s28 }
  0x49   : > { %s397_s30 = scalar_lea.hbm %s1071_s3, %s551_s8  ;;  %s702_s25 = scalar_lea.vmem %s1023_s6, 128 }
  0x4a   : > { %p703_p2 = scmp.ne.s32.totalorder %s1023_s6, %s702_s25  ;;  %s796_s9 = smov [#allocation9]  }
  0x4b   : > { %s706_s15 = sshll.u32 %s796_s9, 4  ;;  %s707_s15 = int_to_ptr.vmem [resolvable:$false] %s706_s15 }
  0x4c   : > { %v260_v1 = vstv %s532_s18  ;;  %p704_p6 = pnand %p703_p2, %p867_p7  ;;  %s708_s27 = scalar_lea.vmem %s707_s15, 256 }
  0x4d   : > { %v966_v2 = vmul.f32 %v260_v1, %v259_v0  ;;  %p709_p10 = scmp.lt.s32.totalorder %s1023_s6, %s707_s15  ;;  %p710_p9 = scmp.lt.s32.totalorder %s708_s27, %s702_s25 }
  0x4e   : > { %p705_p8 = pneg %p704_p6 }
  0x4f   : > { %v263_v3 = vsub.f32 0.0, %v966_v2  ;;  %v275_v6 = vmul.f32 0.5, %v966_v2  ;;  %v282_v9 = vmul.f32 0.33333334, %v966_v2  ;;  %v289_v12 = vmul.f32 0.25, %v966_v2  ;;  %p711_p12 = por %p710_p9, %p709_p10 }
  0x50   : > { %v296_v17 = vmul.f32 0.2, %v966_v2  ;;  %v303_v19 = vmul.f32 0.16666667, %v966_v2  ;;  %v310_v24 = vmul.f32 0.14285715, %v966_v2 }
  0x51   : > { %v264_v4 = vmul.f32 1.442695, %v263_v3  ;;  %v317_v29 = vmul.f32 0.125, %v966_v2  ;;  %v324_v34 = vmul.f32 0.11111111, %v966_v2  ;;  %p712_p0 = pnand %p711_p12, %p705_p8 }
  0x52   : > { %v331_v39 = vmul.f32 0.1, %v966_v2  ;;  %v338_v44 = vmul.f32 0.09090909, %v966_v2  ;;  %v345_v49 = vmul.f32 0.083333336, %v966_v2 }
  0x53   : > { %633 = vpow2.f32 %v264_v4  ;;  %v352_v54 = vmul.f32 0.07692308, %v966_v2  ;;  %v359_v59 = vmul.f32 0.071428575, %v966_v2  ;;  %v366_v0 = vmul.f32 0.06666667, %v966_v2 }
  0x60   : > { %v634_v7 = vpop.eup %633 }
  0x61   : > { %vm266_vm0 = vcmp.ge.f32.partialorder %v969_v5, %v634_v7  ;;  %v269_v8 = vmul.f32 %v634_v7, %v966_v2 }
  0x62   : > { %v533_v14 = vsel %vm266_vm0, 1.0, %v795_v13 }
  0x63   : > { %v270_v10 = vadd.f32 %v634_v7, %v269_v8  ;;  %v276_v11 = vmul.f32 %v275_v6, %v269_v8  ;;  %v373_v7 = vmul.f32 0.0625, %v966_v2 }
  0x65   : > { %vm271_vm1 = vcmp.ge.f32.partialorder %v969_v5, %v270_v10  ;;  %v277_v15 = vadd.f32 %v276_v11, %v270_v10  ;;  %v283_v16 = vmul.f32 %v282_v9, %v276_v11 }
  0x66   : > { %v534_v18 = vsel %vm271_vm1, 1.0, %v795_v13 }
  0x67   : > { %v274_v20 = vadd.f32 %v534_v18, %v533_v14  ;;  %vm278_vm2 = vcmp.ge.f32.partialorder %v969_v5, %v277_v15  ;;  %v284_v21 = vadd.f32 %v283_v16, %v277_v15  ;;  %v290_v22 = vmul.f32 %v289_v12, %v283_v16 }
  0x68   : > { %v535_v23 = vsel %vm278_vm2, 1.0, %v795_v13 }
  0x69   : > { %v281_v25 = vadd.f32 %v535_v23, %v274_v20  ;;  %vm285_vm3 = vcmp.ge.f32.partialorder %v969_v5, %v284_v21  ;;  %v291_v26 = vadd.f32 %v290_v22, %v284_v21  ;;  %v297_v27 = vmul.f32 %v296_v17, %v290_v22 }
  0x6a   : > { %v536_v28 = vsel %vm285_vm3, 1.0, %v795_v13 }
  0x6b   : > { %v288_v30 = vadd.f32 %v536_v28, %v281_v25  ;;  %vm292_vm4 = vcmp.ge.f32.partialorder %v969_v5, %v291_v26  ;;  %v298_v31 = vadd.f32 %v297_v27, %v291_v26  ;;  %v304_v32 = vmul.f32 %v303_v19, %v297_v27 }
  0x6c   : > { %v537_v33 = vsel %vm292_vm4, 1.0, %v795_v13  ;;  %v380_v25 = vstv %s257_s21 }
  0x6d   : > { %v295_v35 = vadd.f32 %v537_v33, %v288_v30  ;;  %vm299_vm5 = vcmp.ge.f32.partialorder %v969_v5, %v298_v31  ;;  %v305_v36 = vadd.f32 %v304_v32, %v298_v31  ;;  %v311_v37 = vmul.f32 %v310_v24, %v304_v32 }
  0x6e   : > { %v538_v38 = vsel %vm299_vm5, 1.0, %v795_v13 }
  0x6f   : > { %v302_v40 = vadd.f32 %v538_v38, %v295_v35  ;;  %vm306_vm6 = vcmp.ge.f32.partialorder %v969_v5, %v305_v36  ;;  %v312_v41 = vadd.f32 %v311_v37, %v305_v36  ;;  %v318_v42 = vmul.f32 %v317_v29, %v311_v37 }
  0x70   : > { %v539_v43 = vsel %vm306_vm6, 1.0, %v795_v13 }
  0x71   : > { %v309_v45 = vadd.f32 %v539_v43, %v302_v40  ;;  %vm313_vm7 = vcmp.ge.f32.partialorder %v969_v5, %v312_v41  ;;  %v319_v46 = vadd.f32 %v318_v42, %v312_v41  ;;  %v325_v47 = vmul.f32 %v324_v34, %v318_v42 }
  0x72   : > { %v540_v48 = vsel %vm313_vm7, 1.0, %v795_v13 }
  0x73   : > { %v316_v50 = vadd.f32 %v540_v48, %v309_v45  ;;  %vm320_vm8 = vcmp.ge.f32.partialorder %v969_v5, %v319_v46  ;;  %v326_v51 = vadd.f32 %v325_v47, %v319_v46  ;;  %v332_v52 = vmul.f32 %v331_v39, %v325_v47 }
  0x74   : > { %v541_v53 = vsel %vm320_vm8, 1.0, %v795_v13 }
  0x75   : > { %v323_v55 = vadd.f32 %v541_v53, %v316_v50  ;;  %vm327_vm9 = vcmp.ge.f32.partialorder %v969_v5, %v326_v51  ;;  %v333_v56 = vadd.f32 %v332_v52, %v326_v51  ;;  %v339_v57 = vmul.f32 %v338_v44, %v332_v52 }
  0x76   : > { %v542_v58 = vsel %vm327_vm9, 1.0, %v795_v13 }
  0x77   : > { %v330_v60 = vadd.f32 %v542_v58, %v323_v55  ;;  %vm334_vm10 = vcmp.ge.f32.partialorder %v969_v5, %v333_v56  ;;  %v340_v61 = vadd.f32 %v339_v57, %v333_v56  ;;  %v346_v62 = vmul.f32 %v345_v49, %v339_v57 }
  0x78   : > { %v543_v63 = vsel %vm334_vm10, 1.0, %v795_v13 }
  0x79   : > { %v337_v1 = vadd.f32 %v543_v63, %v330_v60  ;;  %vm341_vm11 = vcmp.ge.f32.partialorder %v969_v5, %v340_v61  ;;  %v347_v3 = vadd.f32 %v346_v62, %v340_v61  ;;  %v353_v4 = vmul.f32 %v352_v54, %v346_v62 }
  0x7a   : > { %v544_v6 = vsel %vm341_vm11, 1.0, %v795_v13 }
  0x7b   : > { %v344_v8 = vadd.f32 %v544_v6, %v337_v1  ;;  %vm348_vm12 = vcmp.ge.f32.partialorder %v969_v5, %v347_v3  ;;  %v354_v9 = vadd.f32 %v353_v4, %v347_v3  ;;  %v360_v10 = vmul.f32 %v359_v59, %v353_v4 }
  0x7c   : > { %v545_v11 = vsel %vm348_vm12, 1.0, %v795_v13 }
  0x7d   : > { %v351_v12 = vadd.f32 %v545_v11, %v344_v8  ;;  %vm355_vm13 = vcmp.ge.f32.partialorder %v969_v5, %v354_v9  ;;  %v361_v14 = vadd.f32 %v360_v10, %v354_v9  ;;  %v367_v15 = vmul.f32 %v366_v0, %v360_v10 }
  0x7e   : > { %v546_v16 = vsel %vm355_vm13, 1.0, %v795_v13 }
  0x7f   : > { %v358_v17 = vadd.f32 %v546_v16, %v351_v12  ;;  %vm362_vm14 = vcmp.ge.f32.partialorder %v969_v5, %v361_v14  ;;  %v368_v2 = vadd.f32 %v367_v15, %v361_v14  ;;  %v374_v18 = vmul.f32 %v373_v7, %v367_v15 }
  0x80   : > { %v547_v19 = vsel %vm362_vm14, 1.0, %v795_v13 }
  0x81   : > { %v365_v20 = vadd.f32 %v547_v19, %v358_v17  ;;  %vm369_vm15 = vcmp.ge.f32.partialorder %v969_v5, %v368_v2  ;;  %v375_v21 = vadd.f32 %v374_v18, %v368_v2 }
  0x82   : > { %v548_v22 = vsel %vm369_vm15, 1.0, %v795_v13 }
  0x83   : > { %v372_v23 = vadd.f32 %v548_v22, %v365_v20  ;;  %vm376_vm0 = vcmp.ge.f32.partialorder %v969_v5, %v375_v21 }
  0x84   : > { %v549_v24 = vsel %vm376_vm0, 1.0, %v795_v13 }
  0x85   : > { %v379_v26 = vadd.f32 %v549_v24, %v372_v23 }
  0x87   : > { %v381_v27 = vmul.f32 %v380_v25, %v379_v26 }
  0x89   : > { %382 = vst [vmem:[%s256_s29] sm:$0xff] %v381_v27 }
  0x8a   : > { %715 = shalt.err (!%p712_p0)
}
  0x8b   : > { %s716_s0 = scalar_lea.hbm %s397_s30, 128  ;;  %s720_s10 = scalar_lea.hbm %s1071_s3, 256 }
  0x8c   : > { %p717_p13 = scmp.ne.s32.totalorder %s397_s30, %s716_s0  ;;  %p721_p3 = scmp.lt.s32.totalorder %s397_s30, %s1071_s3 }
  0x8d   : > { %p722_p4 = scmp.lt.s32.totalorder %s720_s10, %s716_s0 }
  0x8e   : > { %p718_p1 = pnand %p717_p13, %p867_p7 }
  0x8f   : > { %p723_p5 = por %p722_p4, %p721_p3 }
  0x90   : > { %p719_p11 = pneg %p718_p1 }
  0x92   : > { %p724_p2 = pnand %p723_p5, %p719_p11 }
  0x94   : > { %727 = shalt.err (!%p724_p2)
}
  0x95   : > { %562 = dma.vmem_to_hbm [thread:$0]  (%p867_p7), %s1023_s6, 128, %s397_s30, %s384_s4  }
  0x96 PF: > { %s411_s18 = sand.u32 1, %s770_s12   ;;  %p1081_p6 = scmp.ne.s32.totalorder %s1076_s23, 0 }
  0x97   : > { %p1082_p8 = scmp.ge.s32.totalorder %s790_s17, 2  ;;  %s412_s21 = scalar_lea.sflag [#allocation4], %s411_s18 }
  0x99   : > { %p576_p10 = pnand %p1082_p8, %p1081_p6 }
  0x9b   : > { %p577_p9 = pneg %p576_p10 }
  0x9d   : > { %765 = dma.done.wait (%p577_p9), %s412_s21, 128  }
  0x9e   : > { %767 = vsyncadd (%p577_p9), %s412_s21, 4294967168  ;;  %s23_s17 = sadd.s32 1, %s790_s17   ;;  %s1083_s12 = smov %s774_s13 }
  0x9f   : > { %p20_p12 = scmp.ge.s32.totalorder %s23_s17, 4   ;;  %s1084_s13 = smov %s778_s14 }
  0xa0   : > { %s1085_s14 = smov %s912_s19  ;;  %s1086_s15 = smov %s786_s16 }
  0xa1   : > { %s1087_s16 = smov %s1089_s26  ;;  %22 = sbr.rel (!%p20_p12) target bundleno = 11 (0xb), region = 95 }
  0xa6   :  { %417 = vsyncpa [#allocation3], 1 }
  0xa7   :  { %419 = vsyncpa [#allocation3 + $0x1], 1 }
  0xa8   :  { %420 = vsyncpa [#allocation8], 1 }
  0xa9   :  { %422 = vsyncpa [#allocation8 + $0x1], 1 }
  0xaa   :  { %423 = vsyncpa [#allocation4], 1 }
  0xab   :  { %425 = vsyncpa [#allocation4 + $0x1], 1 }
  0xac   :  { %426 = vsyncpa [#allocation5], 1 }
  0xad   :  { %428 = vsyncpa [#allocation5 + $0x1], 1 }

</bundles_post_ra>
